<compile_context>
chip_gen: v7x
topology: tpu7x:2x2x1
jax: 0.10.0
libtpu: 0.0.40
codegen_flags: <defaults>
</compile_context>

<pallas_src>
import functools

import jax
import jax.numpy as jnp
from jax.experimental import pallas as pl
from jax.experimental.pallas import tpu as pltpu


def _round_up(n, m):
    return (n + m - 1) // m * m


def _choose_batch_tile(b8, block_batch):
    """Pick (tb, b_pad). tb is a multiple of 8 and <= block_batch.

    Preference order (perf review):
      1. tb divides b8 -> no full jnp.pad copy of x on the hot path.
      2. >= 2 grid steps when the batch allows it (v7x megacore sharding).
      3. tb as large as possible (amortize ~0.35 us per grid step).
    Falls back to padding b8 up to a multiple of block_batch only when the batch
    has no usable divisor (would otherwise explode the number of grid steps).
    """
    cap = max(8, (min(block_batch, b8) // 8) * 8)
    tb = 8
    for d in range(cap, 7, -8):
        if b8 % d == 0:
            tb = d
            break
    if b8 > cap and tb * 4 < cap:
        # Degenerate divisors (e.g. b8 = 8 * large_prime): accept one padded copy
        # rather than hundreds of extra grid steps.
        tb = cap
        return tb, _round_up(b8, tb)
    if b8 // tb < 2 and b8 >= 16:
        # Split into >= 2 tiles so both v7x TensorCores get work.
        for d in range(((b8 // 2) // 8) * 8, 7, -8):
            if b8 % d == 0:
                tb = d
                break
    return tb, b8


def predictions_kernel(x_ref, w1_ref, b1_ref, wh_ref, bh_ref, out_ref, *, action_size):
    x = x_ref[...]                                                    # (TB, H) f32

    # ---- l1: Linear(hidden_size, 64) + ReLU (MXU + VPU) --------------------
    h = jnp.dot(x, w1_ref[...], preferred_element_type=jnp.float32)
    h = jnp.maximum(h + b1_ref[...], 0.0)                             # (TB, 64)

    # ---- fused heads: one MXU dot -> [policy_logits | value_logit | pad] ----
    logits = jnp.dot(h, wh_ref[...], preferred_element_type=jnp.float32)
    logits = logits + bh_ref[...]                                     # (TB, 128)

    tb, out_w = logits.shape
    lane = jax.lax.broadcasted_iota(jnp.int32, (tb, out_w), 1)
    is_policy = lane < action_size
    is_value = lane == action_size

    # Numerically-stable masked softmax over the policy lanes only.
    masked = jnp.where(is_policy, logits, jnp.float32(-1e30))
    m = jnp.max(masked, axis=-1, keepdims=True)                       # XLU reduce
    e = jnp.where(is_policy, jnp.exp(logits - m), 0.0)                # EUP exp
    denom = jnp.sum(e, axis=-1, keepdims=True)                        # XLU reduce
    # Exact reciprocal: denom is (TB, 1), so the exact path is essentially free
    # and keeps the policy rows normalized to f32 accuracy.
    policy = e * pl.reciprocal(denom)

    # Value head: extract the single value lane with an XLU masked reduce and run
    # tanh on a (TB, 1) column instead of the whole 128-lane slab (128x fewer
    # EUP pushes than tanh(logits)).
    v_logit = jnp.sum(jnp.where(is_value, logits, 0.0), axis=-1, keepdims=True)
    value = jnp.tanh(v_logit)                                         # (TB, 1)

    # Lane-dense 128-wide output slab: [softmax(policy) | tanh(value) | zeros].
    out = jnp.where(is_policy, policy, jnp.where(is_value, value, 0.0))
    out_ref[...] = out.astype(out_ref.dtype)


def fuse_head_params(params):
    """One-time fusion of the policy/value heads into a single lane-dense slab.

    Hoisted out of the per-call path: the pad/scatter ops previously ran on every
    forward and cost as much as the kernel itself for small-batch inference.
    Returns (w1, b1, wh, bh) with weights as (in, out) and biases as (1, out).
    """
    w1, b1, wp, bp, wv, bv = params
    hsz = w1.shape[1]
    action_size = wp.shape[1]
    out_w = _round_up(action_size + 1, 128)
    wh = jnp.zeros((hsz, out_w), jnp.float32)
    wh = wh.at[:, :action_size].set(wp).at[:, action_size:action_size + 1].set(wv)
    bh = jnp.zeros((1, out_w), jnp.float32)
    bh = bh.at[:, :action_size].set(bp).at[:, action_size:action_size + 1].set(bv)
    return (w1, b1.reshape(1, hsz), wh, bh)


def predictions_net(x, fused_params, *, action_size, block_batch=1024,
                    out_dtype=jnp.float32):
    """x: (batch, hidden_size) f32 -> (policy (batch, action_size), value (batch, 1))."""
    w1, b1, wh, bh = fused_params
    batch, hidden = x.shape
    hsz = w1.shape[1]                        # 64
    out_w = wh.shape[1]                      # 128

    # Batch tiling: sublane-align, then pick a tile that divides the batch so we
    # normally avoid a full jnp.pad copy of x on the hot path.
    b8 = _round_up(batch, 8)
    tb, b_pad = _choose_batch_tile(b8, block_batch)
    if b_pad != batch:
        x = jnp.pad(x, ((0, b_pad - batch), (0, 0)))
    grid = (b_pad // tb,)

    kernel = functools.partial(predictions_kernel, action_size=action_size)

    out = pl.pallas_call(
        kernel,
        out_shape=jax.ShapeDtypeStruct((b_pad, out_w), out_dtype),
        grid_spec=pltpu.PrefetchScalarGridSpec(
            num_scalar_prefetch=0,
            grid=grid,
            in_specs=[
                pl.BlockSpec((tb, hidden), lambda i: (i, 0)),    # x: streamed per tile
                pl.BlockSpec((hidden, hsz), lambda i: (0, 0)),   # W1: VMEM-resident
                pl.BlockSpec((1, hsz), lambda i: (0, 0)),        # b1: VMEM-resident
                pl.BlockSpec((hsz, out_w), lambda i: (0, 0)),    # fused head weight
                pl.BlockSpec((1, out_w), lambda i: (0, 0)),      # fused head bias
            ],
            out_specs=pl.BlockSpec((tb, out_w), lambda i: (i, 0)),
        ),
        compiler_params=pltpu.CompilerParams(
            dimension_semantics=("parallel",),   # v7x: shard batch tiles across 2 TCs
            vmem_limit_bytes=48 * 1024 * 1024,   # safe on all gens (v7x physical = 64 MiB)
        ),
        cost_estimate=pl.CostEstimate(
            flops=2 * b_pad * (hidden * hsz + hsz * out_w),
            transcendentals=b_pad * (out_w + 1),
            bytes_accessed=4 * (b_pad * hidden + b_pad * out_w
                                + hidden * hsz + hsz * out_w + hsz + out_w),
        ),
    )(x, w1, b1, wh, bh)

    # Layout plumbing only (keep inside the same jit so XLA fuses it into consumers).
    policy = out[:batch, :action_size]
    value = out[:batch, action_size:action_size + 1]
    return policy, value


def init_params(key, hidden_size, action_size):
    """Deterministic init mirroring torch.nn.Linear default U(-1/sqrt(fan_in), ...).

    Weights stored as (in_features, out_features) so the kernel computes x @ W.
    Biases are (1, out_features).
    """
    k1, k2, k3, k4, k5, k6 = jax.random.split(key, 6)

    def u(k, shape, fan_in):
        bound = 1.0 / jnp.sqrt(jnp.float32(fan_in))
        return jax.random.uniform(k, shape, jnp.float32, -bound, bound)

    w1 = u(k1, (hidden_size, 64), hidden_size)
    b1 = u(k2, (1, 64), hidden_size)
    wp = u(k3, (64, action_size), 64)
    bp = u(k4, (1, action_size), 64)
    wv = u(k5, (64, 1), 64)
    bv = u(k6, (1, 1), 64)
    return (w1, b1, wp, bp, wv, bv)


def reference(x, params):
    """Pure-JAX reference for sanity checking."""
    w1, b1, wp, bp, wv, bv = params
    h = jnp.maximum(x @ w1 + b1, 0.0)
    policy = jax.nn.softmax(h @ wp + bp, axis=-1)
    value = jnp.tanh(h @ wv + bv)
    return policy, value


if __name__ == "__main__":
    # Tic-tac-toe: action_size = 9; small hidden state.
    batch, hidden_size, action_size = 8, 32, 9

    key = jax.random.PRNGKey(0)
    kx, kp = jax.random.split(key)
    x = jax.random.normal(kx, (batch, hidden_size), dtype=jnp.float32)
    params = init_params(kp, hidden_size, action_size)
    fused = fuse_head_params(params)   # one-time head fusion (not on the hot path)

    fwd = jax.jit(functools.partial(predictions_net,
                                    action_size=action_size, block_batch=1024))

    policy, value = fwd(x, fused)
    jax.block_until_ready((policy, value))

    ref_policy, ref_value = reference(x, params)
    assert policy.shape == (batch, action_size)
    assert value.shape == (batch, 1)
    assert jnp.allclose(policy, ref_policy, atol=1e-4, rtol=1e-4)
    assert jnp.allclose(value, ref_value, atol=1e-4, rtol=1e-4)
    # Exact reciprocal in the softmax -> rows sum to 1 at f32 accuracy.
    assert jnp.allclose(jnp.sum(policy, axis=-1), 1.0, atol=1e-5)

    # Ragged batch exercising the multi-step grid path and padded-row masking.
    x2 = jax.random.normal(jax.random.PRNGKey(1), (100, hidden_size), dtype=jnp.float32)
    p2, v2 = fwd(x2, fused)
    jax.block_until_ready((p2, v2))
    rp2, rv2 = reference(x2, params)
    assert p2.shape == (100, action_size) and v2.shape == (100, 1)
    assert jnp.allclose(p2, rp2, atol=1e-4, rtol=1e-4)
    assert jnp.allclose(v2, rv2, atol=1e-4, rtol=1e-4)

    print("KERNEL_OK")
</pallas_src>

<mosaic_0001>
module attributes {stable_mosaic.version = 11 : i64} {
  func.func @predictions_kernel(%arg0: i32, %arg1: memref<8x32xf32, #tpu.memory_space<vmem>>, %arg2: memref<32x64xf32, #tpu.memory_space<vmem>>, %arg3: memref<1x64xf32, #tpu.memory_space<vmem>>, %arg4: memref<64x128xf32, #tpu.memory_space<vmem>>, %arg5: memref<1x128xf32, #tpu.memory_space<vmem>>, %arg6: memref<8x128xf32, #tpu.memory_space<vmem>>) attributes {dimension_semantics = [#tpu.dimension_semantics<parallel>], iteration_bounds = array<i64: 1>, scalar_prefetch = 0 : i64, scratch_operands = 0 : i64, tpu.core_type = #tpu.core_type<tc>, window_params = [{transform_indices = @transform_0, window_bounds = array<i64: 8, 32>}, {pipeline_mode = #tpu.pipeline_mode<synchronous>, transform_indices = @transform_1, window_bounds = array<i64: 32, 64>}, {pipeline_mode = #tpu.pipeline_mode<synchronous>, transform_indices = @transform_2, window_bounds = array<i64: 1, 64>}, {pipeline_mode = #tpu.pipeline_mode<synchronous>, transform_indices = @transform_3, window_bounds = array<i64: 64, 128>}, {pipeline_mode = #tpu.pipeline_mode<synchronous>, transform_indices = @transform_4, window_bounds = array<i64: 1, 128>}, {transform_indices = @transform_5, window_bounds = array<i64: 8, 128>}]} {
    %c0 = arith.constant 0 : index
    %c0_0 = arith.constant 0 : index
    %0 = vector.load %arg1[%c0, %c0_0] : memref<8x32xf32, #tpu.memory_space<vmem>>, vector<8x32xf32>
    %c0_1 = arith.constant 0 : index
    %c0_2 = arith.constant 0 : index
    %1 = vector.load %arg2[%c0_1, %c0_2] : memref<32x64xf32, #tpu.memory_space<vmem>>, vector<32x64xf32>
    %cst = arith.constant dense<0.000000e+00> : vector<8x64xf32>
    %2 = tpu.matmul %0, %1, %cst {dimension_numbers = #tpu.dot_dimension_numbers<[1], [0], [0], [1], [0, 0, 1, 1], [], []>} : vector<8x32xf32>, vector<32x64xf32>, vector<8x64xf32> -> vector<8x64xf32>
    %c0_3 = arith.constant 0 : index
    %c0_4 = arith.constant 0 : index
    %3 = vector.load %arg3[%c0_3, %c0_4] : memref<1x64xf32, #tpu.memory_space<vmem>>, vector<1x64xf32>
    %4 = vector.broadcast %3 : vector<1x64xf32> to vector<8x64xf32>
    %5 = arith.addf %2, %4 : vector<8x64xf32>
    %cst_5 = arith.constant 0.000000e+00 : f32
    %6 = vector.broadcast %cst_5 : f32 to vector<8x64xf32>
    %7 = arith.maximumf %5, %6 : vector<8x64xf32>
    %c0_6 = arith.constant 0 : index
    %c0_7 = arith.constant 0 : index
    %8 = vector.load %arg4[%c0_6, %c0_7] : memref<64x128xf32, #tpu.memory_space<vmem>>, vector<64x128xf32>
    %cst_8 = arith.constant dense<0.000000e+00> : vector<8x128xf32>
    %9 = tpu.matmul %7, %8, %cst_8 {dimension_numbers = #tpu.dot_dimension_numbers<[1], [0], [0], [1], [0, 0, 1, 1], [], []>} : vector<8x64xf32>, vector<64x128xf32>, vector<8x128xf32> -> vector<8x128xf32>
    %c0_9 = arith.constant 0 : index
    %c0_10 = arith.constant 0 : index
    %10 = vector.load %arg5[%c0_9, %c0_10] : memref<1x128xf32, #tpu.memory_space<vmem>>, vector<1x128xf32>
    %11 = vector.broadcast %10 : vector<1x128xf32> to vector<8x128xf32>
    %12 = arith.addf %9, %11 : vector<8x128xf32>
    %13 = tpu.iota {dimensions = array<i32: 1>} : vector<8x128xi32>
    %c9_i32 = arith.constant 9 : i32
    %14 = vector.broadcast %c9_i32 : i32 to vector<8x128xi32>
    %15 = arith.cmpi slt, %13, %14 : vector<8x128xi32>
    %c9_i32_11 = arith.constant 9 : i32
    %16 = vector.broadcast %c9_i32_11 : i32 to vector<8x128xi32>
    %17 = arith.cmpi eq, %13, %16 : vector<8x128xi32>
    %cst_12 = arith.constant -1.000000e+30 : f32
    %18 = vector.broadcast %cst_12 : f32 to vector<8x128xf32>
    %19 = arith.select %15, %12, %18 : vector<8x128xi1>, vector<8x128xf32>
    %cst_13 = arith.constant dense<0xFF800000> : vector<8xf32>
    %20 = vector.multi_reduction <maximumf>, %19, %cst_13 [1] : vector<8x128xf32> to vector<8xf32>
    %21 = vector.shape_cast %20 : vector<8xf32> to vector<8x1xf32>
    %22 = vector.broadcast %21 : vector<8x1xf32> to vector<8x128xf32>
    %23 = arith.subf %12, %22 : vector<8x128xf32>
    %24 = math.exp %23 : vector<8x128xf32>
    %cst_14 = arith.constant 0.000000e+00 : f32
    %25 = vector.broadcast %cst_14 : f32 to vector<8x128xf32>
    %26 = arith.select %15, %24, %25 : vector<8x128xi1>, vector<8x128xf32>
    %cst_15 = arith.constant dense<0.000000e+00> : vector<8xf32>
    %27 = vector.multi_reduction <add>, %26, %cst_15 [1] : vector<8x128xf32> to vector<8xf32>
    %28 = vector.shape_cast %27 : vector<8xf32> to vector<8x1xf32>
    %29 = tpu.reciprocal %28 : vector<8x1xf32> -> vector<8x1xf32>
    %30 = vector.broadcast %29 : vector<8x1xf32> to vector<8x128xf32>
    %31 = arith.mulf %26, %30 : vector<8x128xf32>
    %cst_16 = arith.constant 0.000000e+00 : f32
    %32 = vector.broadcast %cst_16 : f32 to vector<8x128xf32>
    %33 = arith.select %17, %12, %32 : vector<8x128xi1>, vector<8x128xf32>
    %cst_17 = arith.constant dense<0.000000e+00> : vector<8xf32>
    %34 = vector.multi_reduction <add>, %33, %cst_17 [1] : vector<8x128xf32> to vector<8xf32>
    %35 = vector.shape_cast %34 : vector<8xf32> to vector<8x1xf32>
    %36 = math.tanh %35 : vector<8x1xf32>
    %cst_18 = arith.constant 0.000000e+00 : f32
    %37 = vector.shape_cast %36 : vector<8x1xf32> to vector<8x1xf32>
    %38 = vector.broadcast %37 : vector<8x1xf32> to vector<8x128xf32>
    %39 = vector.broadcast %cst_18 : f32 to vector<8x128xf32>
    %40 = arith.select %17, %38, %39 : vector<8x128xi1>, vector<8x128xf32>
    %41 = arith.select %15, %31, %40 : vector<8x128xi1>, vector<8x128xf32>
    %c0_19 = arith.constant 0 : index
    %c0_20 = arith.constant 0 : index
    %42 = vector.load %arg6[%c0_19, %c0_20] : memref<8x128xf32, #tpu.memory_space<vmem>>, vector<8x128xf32>
    tpu.vector_store %arg6[%c0_19, %c0_20], %41 {strides = array<i32>} : memref<8x128xf32, #tpu.memory_space<vmem>>, vector<8x128xf32>,
    return
  }
  func.func @transform_0(%arg0: i32) -> (i32, i32) {
    %c0_i32 = arith.constant 0 : i32
    %c0_i32_0 = arith.constant 0 : i32
    return %arg0, %c0_i32 : i32, i32
  }
  func.func @transform_1(%arg0: i32) -> (i32, i32) {
    %c0_i32 = arith.constant 0 : i32
    %c0_i32_0 = arith.constant 0 : i32
    %c0_i32_1 = arith.constant 0 : i32
    return %c0_i32, %c0_i32_0 : i32, i32
  }
  func.func @transform_2(%arg0: i32) -> (i32, i32) {
    %c0_i32 = arith.constant 0 : i32
    %c0_i32_0 = arith.constant 0 : i32
    %c0_i32_1 = arith.constant 0 : i32
    return %c0_i32, %c0_i32_0 : i32, i32
  }
  func.func @transform_3(%arg0: i32) -> (i32, i32) {
    %c0_i32 = arith.constant 0 : i32
    %c0_i32_0 = arith.constant 0 : i32
    %c0_i32_1 = arith.constant 0 : i32
    return %c0_i32, %c0_i32_0 : i32, i32
  }
  func.func @transform_4(%arg0: i32) -> (i32, i32) {
    %c0_i32 = arith.constant 0 : i32
    %c0_i32_0 = arith.constant 0 : i32
    %c0_i32_1 = arith.constant 0 : i32
    return %c0_i32, %c0_i32_0 : i32, i32
  }
  func.func @transform_5(%arg0: i32) -> (i32, i32) {
    %c0_i32 = arith.constant 0 : i32
    %c0_i32_0 = arith.constant 0 : i32
    return %arg0, %c0_i32 : i32, i32
  }
}

</mosaic_0001>

<bundles_post_ra>
// kernel: predictions_net.1
= control target key start
LH: loop header
LB: loop body
LE: loop exit
PB: predicated region body
PF: predicated region fallthrough
CT: control target
= control target key end

     0   :  { %10 = vsyncpa [#allocation3], 0  ;;  %s507_s0 = inlined_call_operand.hbm [shape: f32[8,32], index: 0, kind: input, shape index: {}]   ;;  %s508_s1 = inlined_call_operand.hbm [shape: f32[32,64], index: 1, kind: input, shape index: {}]   ;;  %s509_s2 = inlined_call_operand.vmem [shape: f32[1,64], index: 2, kind: input, shape index: {}]   ;;  %s510_s3 = inlined_call_operand.hbm [shape: f32[64,128], index: 3, kind: input, shape index: {}]   ;;  %s511_s4 = inlined_call_operand.vmem [shape: f32[1,128], index: 4, kind: input, shape index: {}]   ;;  %s512_s5 = inlined_call_operand.vmem [shape: f32[8,128], index: 5, kind: output, shape index: {}]  }
   0x1   :  { %11 = vsyncpa [#allocation5], 0  ;;  %s413_s18 = smov [#allocation4]   ;;  %s343_s22 = scalar_lea.hbm %s508_s1, 512 }
   0x2   :  { %s27_s19 = sshll.u32 %s413_s18, 4  ;;  %p344_p0 = scmp.ne.s32.totalorder %s508_s1, %s343_s22  ;;  %s28_s19 = int_to_ptr.vmem [resolvable:$true] %s27_s19 }
   0x3   :  { %p347_p1 = scmp.lt.u32.totalorder %s343_s22, %s508_s1 }
   0x5   :  { %p349_p2 = pnand %p347_p1, %p344_p0 }
   0x7   :  { %352 = shalt.err (!%p349_p2)
}
   0x8   :  { %s353_s27 = scalar_lea.vmem %s28_s19, 512  ;;  %p358_p4 = scmp.lt.s32.totalorder %s28_s19, %s28_s19 }
   0x9   :  { %p354_p3 = scmp.ne.s32.totalorder %s28_s19, %s353_s27  ;;  %p359_p5 = scmp.lt.s32.totalorder %s353_s27, %s353_s27 }
   0xb   :  { %p360_p6 = por %p359_p5, %p358_p4 }
   0xd   :  { %p361_p7 = pnand %p360_p6, %p354_p3 }
   0xf   :  { %364 = shalt.err (!%p361_p7)
}
  0x10   :  { %s414_s28 = smov 128   ;;  %s415_s29 = smov 8  }
  0x11   :  { %33 = dma.hbm_to_vmem [thread:$0]  %s508_s1, 512, %s28_s19, [#allocation5], %s414_s28, %s414_s28, %s415_s29  }
  0x12   :  { %s416_s7 = smov [#allocation2]   ;;  %s417_s9 = smov [#allocation6]  }
  0x13   :  { %s18_s8 = sshll.u32 %s416_s7, 4  ;;  %s41_s10 = sshll.u32 %s417_s9, 4  ;;  %s19_s8 = int_to_ptr.vmem [resolvable:$true] %s18_s8  ;;  %s42_s10 = int_to_ptr.vmem [resolvable:$true] %s41_s10 }
  0x14   :  { %s365_s13 = scalar_lea.hbm %s507_s0, 128 }
  0x15   :  { %p366_p8 = scmp.ne.s32.totalorder %s507_s0, %s365_s13  ;;  %p369_p9 = scmp.lt.u32.totalorder %s365_s13, %s507_s0 }
  0x17   :  { %p371_p10 = pnand %p369_p9, %p366_p8 }
  0x19   :  { %374 = shalt.err (!%p371_p10)
}
  0x1a   :  { %s375_s1 = scalar_lea.vmem %s19_s8, 128  ;;  %p380_p12 = scmp.lt.s32.totalorder %s19_s8, %s19_s8 }
  0x1b   :  { %p376_p11 = scmp.ne.s32.totalorder %s19_s8, %s375_s1  ;;  %p381_p13 = scmp.lt.s32.totalorder %s375_s1, %s375_s1 }
  0x1d   :  { %p382_p0 = por %p381_p13, %p380_p12 }
  0x1f   :  { %p383_p1 = pnand %p382_p0, %p376_p11 }
  0x21   :  { %386 = shalt.err (!%p383_p1)
}
  0x22   :  { %21 = dma.hbm_to_vmem [thread:$0]  %s507_s0, 128, %s19_s8, [#allocation3]  }
  0x23   :  { %s387_s22 = scalar_lea.hbm %s510_s3, 1024 }
  0x24   :  { %p388_p2 = scmp.ne.s32.totalorder %s510_s3, %s387_s22  ;;  %p391_p3 = scmp.lt.u32.totalorder %s387_s22, %s510_s3 }
  0x26   :  { %p393_p4 = pnand %p391_p3, %p388_p2 }
  0x28   :  { %396 = shalt.err (!%p393_p4)
}
  0x29   :  { %s397_s27 = scalar_lea.vmem %s42_s10, 1024  ;;  %p402_p6 = scmp.lt.s32.totalorder %s42_s10, %s42_s10 }
  0x2a   :  { %p398_p5 = scmp.ne.s32.totalorder %s42_s10, %s397_s27  ;;  %p403_p7 = scmp.lt.s32.totalorder %s397_s27, %s397_s27 }
  0x2c   :  { %p404_p8 = por %p403_p7, %p402_p6 }
  0x2e   :  { %p405_p9 = pnand %p404_p8, %p398_p5 }
  0x30   :  { %408 = shalt.err (!%p405_p9)
}
  0x31   :  { %47 = dma.hbm_to_vmem [thread:$0]  %s510_s3, 1024, %s42_s10, [#allocation5], %s414_s28, %s414_s28, %s415_s29  }
  0x32   :  { %409 = dma.done.wait [#allocation3], 128  }
  0x33   :  { %410 = vsyncadd [#allocation3], 4294967168 }
  0x34   :  { %411 = dma.done.wait [#allocation5], 1536  }
  0x35   :  { %412 = vsyncadd [#allocation5], 4294965760  ;;  %v418_v0 = vmov 0.0|0.0   ;;  %vm419_vm0 = vmmov 0   ;;  %v420_v1 = vmov 0.0   ;;  %v60_v2 = vld [vmem:[#allocation4] sm:$0xff]  ;;  %v235_v26 = vlaneseq }
  0x36   :  { %311 = vmatprep.subr.bf16.mxu0 %v418_v0  ;;  %289 = vmatprep.mubr.msk.f32.mxu0 %vm419_vm0, %v420_v1  ;;  %v61_v3 = vld [vmem:[#allocation4 + $0x8] sm:$0xff]  ;;  %v62_v4 = vld [vmem:[#allocation4 + $0x10] sm:$0xff]  ;;  %v63_v6 = vld [vmem:[#allocation4 + $0x18] sm:$0xff]  ;;  %vm71_vm1 = vcmask 261120   ;;  %vm161_vm2 = vcmask 523264  }
  0x37   :  { %317 = vmatprep.subr.bf16.mxu1 %v418_v0  ;;  %308 = vmatprep.mubr.msk.f32.mxu1 %vm419_vm0, %v420_v1  ;;  %v312_v5 = vpack.c.bf16 %v61_v3, %v60_v2  ;;  %v146_v7 = vld [vmem:[#allocation6] sm:$0xff]  ;;  %v147_v8 = vld [vmem:[#allocation6 + $0x8] sm:$0xff]  ;;  %v148_v9 = vld [vmem:[#allocation6 + $0x10] sm:$0xff]  ;;  %v315_v11 = vpack.c.bf16 %v63_v6, %v62_v4  ;;  %v236_v27 = vand.u32 127, %v235_v26 }
  0x38   :  { %v149_v10 = vld [vmem:[#allocation6 + $0x18] sm:$0xff]  ;;  %v318_v12 = vpack.c.bf16 %v147_v8, %v146_v7  ;;  %v150_v14 = vld [vmem:[#allocation6 + $0x20] sm:$0xff]  ;;  %v151_v15 = vld [vmem:[#allocation6 + $0x28] sm:$0xff] }
  0x39   :  { %313 = vmatpush3.bf16.msra.mxu0 %v312_v5  ;;  %v321_v13 = vpack.c.bf16 %v149_v10, %v148_v9  ;;  %v59_v16 = vld [vmem:[#allocation2] sm:$0xff]  ;;  %v324_v17 = vpack.c.bf16 %v151_v15, %v150_v14  ;;  %v152_v18 = vld [vmem:[#allocation6 + $0x30] sm:$0xff]  ;;  %vm238_vm3 = vcmp.eq.s32.totalorder %v236_v27, 9  ;;  %vm237_vm4 = vcmp.lt.s32.totalorder %v236_v27, 9 }
  0x3a   :  { %314 = vmatprep.subr.bf16.mxu0 %v418_v0  ;;  %319 = vmatpush3.bf16.msra.mxu1 %v318_v12  ;;  %v153_v19 = vld [vmem:[#allocation6 + $0x38] sm:$0xff] }
  0x3b   :  { %320 = vmatprep.subr.bf16.mxu1 %v418_v0  ;;  %v327_v20 = vpack.c.bf16 %v153_v19, %v152_v18  ;;  %v263_v21 = vld [vmem:[%s509_s2] ss:$0 sm:$0xff] }
  0x3c   :  { %v265_v28 = vld [vmem:[%s511_s4] ss:$0 sm:$0xff] }
  0x3d   :  { %316 = vmatpush3.bf16.msra.mxu0 %v315_v11 }
  0x3e   :  { %322 = vmatpush3.bf16.msra.mxu1 %v321_v13 }
  0x3f   :  { %323 = vmatprep.subr.bf16.mxu1 %v418_v0 }
  0x40   :  { %290 = vmatmul.mubr.msk.f32.vlgmr.msra.gmra.mrb[0].mxu0 %vm71_vm1, %v59_v16 }
  0x42   :  { %325 = vmatpush3.bf16.msra.mxu1 %v324_v17 }
  0x43   :  { %326 = vmatprep.subr.bf16.mxu1 %v418_v0 }
  0x46   :  { %328 = vmatpush3.bf16.msra.mxu1 %v327_v20 }
 0x113   :  { %v141_v22 = vpop.f32.mrb[0].mxu0 }
 0x114   :  { %v142_v23 = vadd.f32 %v263_v21, %v141_v22  ;;  %v291_v24 = vpop.f32.mrb[1].mxu0 }
 0x116   :  { %v145_v25 = vmax.f32 %v142_v23, 0.0 }
 0x118   :  { %309 = vmatmul.mubr.msk.f32.vlgmr.msra.gmra.mrb[0].mxu1 %vm161_vm2, %v145_v25 }
 0x1eb   :  { %v231_v29 = vpop.f32.mrb[0].mxu1 }
 0x1ec   :  { %v232_v30 = vadd.f32 %v265_v28, %v231_v29  ;;  %v310_v31 = vpop.f32.mrb[1].mxu1 }
 0x1ee   :  { %v250_v32 = vsel %vm238_vm3, %v232_v30, 0.0  ;;  %v239_v33 = vsel %vm237_vm4, %v232_v30, -1e+30 }
 0x1ef   :  { %251 = vadd.xlane.f32.xlu1 %v250_v32  ;;  %240 = vmax.xlane.f32.xlu0 %v239_v33 }
 0x27c   :  { %v241_v34 = vpop.xlane.xlu0 %240  ;;  %v252_v39 = vpop.xlane.xlu1 %251 }
 0x27d   :  { %v242_v35 = vsub.f32 %v232_v30, %v241_v34 }
 0x27f   :  { %v243_v36 = vmul.f32 1.442695, %v242_v35 }
 0x281   :  { %337 = vpow2.f32 %v243_v36 }
 0x282   :  { %339 = vtanh.f32 %v252_v39 }
 0x28b   :  { %v338_v37 = vpop.eup %337 }
 0x28c   :  { %v245_v38 = vsel %vm237_vm4, %v338_v37, 0.0  ;;  %v340_v41 = vpop.eup %339 }
 0x28d   :  { %246 = vadd.xlane.f32.xlu0 %v245_v38  ;;  %v254_v44 = vsel %vm238_vm3, %v340_v41, 0.0 }
 0x31a   :  { %v247_v40 = vpop.xlane.xlu0 %246 }
 0x31b   :  { %341 = vrcp.f32 %v247_v40 }
 0x325   :  { %v342_v42 = vpop.eup %341 }
 0x326   :  { %v249_v43 = vmul.f32 %v342_v42, %v245_v38 }
 0x328   :  { %v255_v45 = vsel %vm237_vm4, %v249_v43, %v254_v44 }
 0x329   :  { %256 = vst [vmem:[%s512_s5] sm:$0xff] %v255_v45 }
 0x32a   :  { %261 = vsyncpa [#allocation3], 1 }
 0x32b   :  { %262 = vsyncpa [#allocation5], 1 }

</bundles_post_ra>
